<compile_context>
chip_gen: v5e
topology: v5e:2x2
jax: 0.10.0
libtpu: 0.0.40
codegen_flags: <defaults>
</compile_context>

<pallas_src>
import functools

import jax
import jax.numpy as jnp
from jax.experimental import pallas as pl
from jax.experimental.pallas import tpu as pltpu


def _deconv_gemm_kernel(w_ref, b_ref, x_ref, o_ref, *, precision):
    # w_ref: (R, Cin)   deconv weights, rows ordered (co, di, dj); grid-resident
    # b_ref: (R, 1)     per-row bias; grid-resident
    # x_ref: (Cin, tm)  spatial tile of one image; lane dim tm is a multiple of 128
    # o_ref: (R, tm)    lane-dense output tile (unmasked stores)
    acc = jnp.dot(
        w_ref[...], x_ref[...],
        preferred_element_type=jnp.float32,
        precision=precision,
    )
    o_ref[...] = (acc + b_ref[...]).astype(o_ref.dtype)


def _round_up(x, m):
    return ((x + m - 1) // m) * m


def _tpu_hw_info():
    """(tensorcores_per_chip, vmem_capacity_bytes) with conservative fallbacks."""
    cores, vmem = 1, 64 << 20          # v7x-safe defaults if the query fails
    try:
        info = pltpu.get_tpu_info()
        vmem = int(getattr(info, "vmem_capacity_bytes", vmem))
        for attr in ("num_cores", "tensorcores_per_chip", "num_tensorcores"):
            val = getattr(info, attr, None)
            if isinstance(val, int) and val > 0:
                cores = val
                break
    except Exception:
        pass
    try:
        kind = str(getattr(jax.devices()[0], "device_kind", "")).lower()
        if "v7" in kind:               # 2 TensorCores / 64 MiB VMEM per core
            cores = max(cores, 2)
            vmem = min(vmem, 64 << 20)
    except Exception:
        pass
    return cores, vmem


def _divisor_tile(m_sp, cap):
    """Largest multiple of 128 that divides m_sp and is <= cap (0 if none)."""
    if m_sp % 128 != 0:
        return 0
    d = (min(cap, m_sp) // 128) * 128
    while d >= 128 and m_sp % d:
        d -= 128
    return max(d, 0)


def _choose_spatial_tile(m_sp, tm_budget, n_batch, num_cores):
    """Pick (tm, m_pad): lane tile (multiple of 128) and padded spatial extent."""
    m128 = _round_up(m_sp, 128)
    cap = max(128, min((tm_budget // 128) * 128, m128))

    # Prefer a tile that divides H*W exactly (no spatial-padding pass over x), unless
    # awkward factors would collapse it far below the budget -- then pad H*W up to the
    # budget tile instead (dead columns are cheap; tile 128 is a 2-3x roofline loss).
    tm = _divisor_tile(m_sp, cap)
    if tm < min(512, cap):
        tm = cap

    # Pipelining / megacore: aim for >=2 grid steps per TensorCore (target 4 per core on
    # multi-core chips) but never shrink below 512 lanes on single-core chips (v5e/v6e:
    # extra steps cost ~0.35us each with no parallelism benefit) nor below 128 on v7x.
    floor = 512 if num_cores == 1 else 128
    min_steps = 2 if num_cores == 1 else 4 * num_cores
    steps = n_batch * (_round_up(m_sp, tm) // tm)
    if steps < min_steps and tm > floor:
        tiles_per_image = -(-min_steps // n_batch)
        tm_new = min(tm, max(floor, (m128 // tiles_per_image // 128) * 128))
        tm_div = _divisor_tile(m_sp, tm_new)
        tm = tm_div if tm_div >= max(floor, tm_new // 2) else tm_new

    return tm, _round_up(m_sp, tm)


@functools.partial(
    jax.jit, static_argnames=("tm_max", "apply_pixel_shuffle", "precision")
)
def single_deconv2d_block(x_nchw, weight, bias, *, tm_max=8192,
                          apply_pixel_shuffle=True, precision=None):
    """ConvTranspose2d(Cin, Cout, kernel_size=2, stride=2, padding=0) forward.

    x_nchw : (N, Cin, H, W)     float32
    weight : (Cin, Cout, 2, 2)  float32   (PyTorch ConvTranspose2d weight layout)
    bias   : (Cout,)            float32
    returns: (N, Cout, 2H, 2W)  float32   (or the pre-shuffle (N, Cout, 2, 2, H, W)
                                           tensor when apply_pixel_shuffle=False, so a
                                           downstream consumer can fuse the shuffle)
    """
    N, Cin, H, W = x_nchw.shape
    Cout = weight.shape[1]
    R = 4 * Cout                                   # GEMM rows, ordered (co, di, dj)
    m_sp = H * W

    # ---- tiling derived from the chip's VMEM capacity / TensorCore count -----------
    cores, vmem_cap = _tpu_hw_info()
    bytes_el = 4
    weight_bytes = 2 * (R * Cin + R) * bytes_el          # w + bias, double-buffered
    per_col_bytes = 2 * (Cin + R) * bytes_el             # dbl-buffered x col + out col
    headroom = 2 << 20
    vmem_target = max(16 << 20, min(vmem_cap // 2, 96 << 20))
    tm_budget = max(128, (vmem_target - weight_bytes - headroom) // per_col_bytes)
    tm, m_pad = _choose_spatial_tile(m_sp, min(tm_budget, tm_max), N, cores)

    # ---- host-side prep: x is only reshaped (contiguous, no copy); no Cin padding. ---
    x_flat = x_nchw.reshape(N, Cin, m_sp)
    if m_pad != m_sp:                                    # only for awkward H*W factors
        x_flat = jnp.pad(x_flat, ((0, 0), (0, 0), (0, m_pad - m_sp)))

    # (Cin, Cout, 2, 2) -> (R, Cin), rows ordered (co, di, dj); bias replicated per row.
    w_mat = jnp.transpose(weight, (1, 2, 3, 0)).reshape(R, Cin)
    b_col = jnp.repeat(bias, 4).reshape(R, 1)

    grid = (N, m_pad // tm)

    vmem_need = per_col_bytes * tm + weight_bytes + headroom
    limit_cap = (32 << 20) if vmem_cap <= (64 << 20) else (100 << 20)
    vmem_limit = int(min(max(vmem_need + (4 << 20), 8 << 20), limit_cap))

    cost = pl.CostEstimate(
        flops=2 * N * m_sp * Cin * R,
        transcendentals=0,
        bytes_accessed=bytes_el * (N * Cin * m_pad + R * Cin + R + N * R * m_pad),
    )

    y = pl.pallas_call(
        functools.partial(_deconv_gemm_kernel, precision=precision),
        out_shape=jax.ShapeDtypeStruct((N, R, m_pad), jnp.float32),
        grid_spec=pl.GridSpec(
            grid=grid,
            in_specs=[
                pl.BlockSpec((R, Cin), lambda n, m: (0, 0)),            # weights (resident)
                pl.BlockSpec((R, 1), lambda n, m: (0, 0)),              # bias    (resident)
                pl.BlockSpec((None, Cin, tm), lambda n, m: (n, 0, m)),  # x spatial tile
            ],
            out_specs=pl.BlockSpec((None, R, tm), lambda n, m: (n, 0, m)),
        ),
        compiler_params=pltpu.CompilerParams(
            dimension_semantics=("parallel", "parallel"),
            vmem_limit_bytes=vmem_limit,
        ),
        cost_estimate=cost,
    )(w_mat, b_col, x_flat)

    # ---- epilogue: (co, di, dj)-major rows + flat spatial -> NCHW pixel shuffle.
    # Single fused XLA pass (slice is a no-op when m_pad == m_sp).  See TODO(synk) above.
    if m_pad != m_sp:
        y = y[:, :, :m_sp]
    y = y.reshape(N, Cout, 2, 2, H, W)
    if not apply_pixel_shuffle:
        return y
    return jnp.transpose(y, (0, 1, 4, 2, 5, 3)).reshape(N, Cout, 2 * H, 2 * W)


def _reference_deconv(x_nchw, weight, bias):
    # Pure-JAX reference of ConvTranspose2d(k=2, s=2, p=0) for validation.
    N, Cin, H, W = x_nchw.shape
    Cout = weight.shape[1]
    y = jnp.einsum("nchw,cokl->nohwkl", x_nchw, weight)   # (N, Cout, H, W, 2, 2)
    y = jnp.transpose(y, (0, 1, 2, 4, 3, 5)).reshape(N, Cout, 2 * H, 2 * W)
    return y + bias[None, :, None, None]


if __name__ == "__main__":
    # Module config: in_planes=4, out_planes=8 ; input (N=2, Cin=4, H=16, W=16)
    in_planes, out_planes = 4, 8
    N, H, W = 2, 16, 16

    key = jax.random.PRNGKey(0)
    kx, kw, kb = jax.random.split(key, 3)

    # Snap test data to the bf16 grid so the kernel/reference comparison is independent of
    # the MXU's default f32->bf16 pass handling (products of bf16-exact values are exact
    # in the f32 accumulator on both paths).
    def _bf16_exact(a):
        return a.astype(jnp.bfloat16).astype(jnp.float32)

    x = _bf16_exact(jax.random.normal(kx, (N, in_planes, H, W), dtype=jnp.float32))
    weight = _bf16_exact(
        0.1 * jax.random.normal(kw, (in_planes, out_planes, 2, 2), dtype=jnp.float32))
    bias = _bf16_exact(0.1 * jax.random.normal(kb, (out_planes,), dtype=jnp.float32))

    out = jax.block_until_ready(single_deconv2d_block(x, weight, bias))

    assert out.shape == (N, out_planes, 2 * H, 2 * W), out.shape
    ref = _reference_deconv(x, weight, bias)
    max_err = float(jnp.max(jnp.abs(out - ref)))
    assert max_err < 1e-4, max_err

    print("KERNEL_OK")
</pallas_src>

<mosaic_0001>
module attributes {stable_mosaic.version = 11 : i64} {
  func.func @_deconv_gemm_kernel(%arg0: i32, %arg1: i32, %arg2: memref<32x4xf32, #tpu.memory_space<vmem>>, %arg3: memref<32x1xf32, #tpu.memory_space<vmem>>, %arg4: memref<1x4x256xf32, #tpu.memory_space<vmem>>, %arg5: memref<1x32x256xf32, #tpu.memory_space<vmem>>) attributes {dimension_semantics = [#tpu.dimension_semantics<parallel>, #tpu.dimension_semantics<parallel>], iteration_bounds = array<i64: 2, 1>, scalar_prefetch = 0 : i64, scratch_operands = 0 : i64, tpu.core_type = #tpu.core_type<tc>, window_params = [{pipeline_mode = #tpu.pipeline_mode<synchronous>, transform_indices = @transform_0, window_bounds = array<i64: 32, 4>}, {pipeline_mode = #tpu.pipeline_mode<synchronous>, transform_indices = @transform_1, window_bounds = array<i64: 32, 1>}, {transform_indices = @transform_2, window_bounds = array<i64: 1, 4, 256>}, {transform_indices = @transform_3, window_bounds = array<i64: 1, 32, 256>}]} {
    %c0 = arith.constant 0 : index
    %c0_0 = arith.constant 0 : index
    %0 = vector.load %arg2[%c0, %c0_0] : memref<32x4xf32, #tpu.memory_space<vmem>>, vector<32x4xf32>
    %c0_1 = arith.constant 0 : index
    %c0_2 = arith.constant 0 : index
    %c0_3 = arith.constant 0 : index
    %1 = vector.load %arg4[%c0_1, %c0_2, %c0_3] : memref<1x4x256xf32, #tpu.memory_space<vmem>>, vector<1x4x256xf32>
    %2 = vector.shape_cast %1 : vector<1x4x256xf32> to vector<4x256xf32>
    %cst = arith.constant dense<0.000000e+00> : vector<32x256xf32>
    %3 = tpu.matmul %0, %2, %cst {dimension_numbers = #tpu.dot_dimension_numbers<[1], [0], [0], [1], [0, 0, 1, 1], [], []>} : vector<32x4xf32>, vector<4x256xf32>, vector<32x256xf32> -> vector<32x256xf32>
    %c0_4 = arith.constant 0 : index
    %c0_5 = arith.constant 0 : index
    %4 = vector.load %arg3[%c0_4, %c0_5] : memref<32x1xf32, #tpu.memory_space<vmem>>, vector<32x1xf32>
    %5 = vector.broadcast %4 : vector<32x1xf32> to vector<32x256xf32>
    %6 = arith.addf %3, %5 : vector<32x256xf32>
    %c0_6 = arith.constant 0 : index
    %c0_7 = arith.constant 0 : index
    %c0_8 = arith.constant 0 : index
    %7 = vector.load %arg5[%c0_6, %c0_7, %c0_8] : memref<1x32x256xf32, #tpu.memory_space<vmem>>, vector<1x32x256xf32>
    %8 = vector.shape_cast %7 : vector<1x32x256xf32> to vector<32x256xf32>
    %9 = vector.shape_cast %6 : vector<32x256xf32> to vector<1x32x256xf32>
    tpu.vector_store %arg5[%c0_6, %c0_7, %c0_8], %9 {strides = array<i32>} : memref<1x32x256xf32, #tpu.memory_space<vmem>>, vector<1x32x256xf32>,
    return
  }
  func.func @transform_0(%arg0: i32, %arg1: i32) -> (i32, i32) {
    %c0_i32 = arith.constant 0 : i32
    %c0_i32_0 = arith.constant 0 : i32
    %c0_i32_1 = arith.constant 0 : i32
    return %c0_i32, %c0_i32_0 : i32, i32
  }
  func.func @transform_1(%arg0: i32, %arg1: i32) -> (i32, i32) {
    %c0_i32 = arith.constant 0 : i32
    %c0_i32_0 = arith.constant 0 : i32
    %c0_i32_1 = arith.constant 0 : i32
    return %c0_i32, %c0_i32_0 : i32, i32
  }
  func.func @transform_2(%arg0: i32, %arg1: i32) -> (i32, i32, i32) {
    %c0_i32 = arith.constant 0 : i32
    %c0_i32_0 = arith.constant 0 : i32
    return %arg0, %c0_i32, %arg1 : i32, i32, i32
  }
  func.func @transform_3(%arg0: i32, %arg1: i32) -> (i32, i32, i32) {
    %c0_i32 = arith.constant 0 : i32
    %c0_i32_0 = arith.constant 0 : i32
    return %arg0, %c0_i32, %arg1 : i32, i32, i32
  }
}

</mosaic_0001>

<bundles_post_ra>
// kernel: single_deconv2d_block.1
= control target key start
LH: loop header
LB: loop body
LE: loop exit
PB: predicated region body
PF: predicated region fallthrough
CT: control target
= control target key end

     0   :  { %s511_s12 = smov 0   ;;  %s513_s13 = smov 0   ;;  %s580_s0 = inlined_call_operand.vmem [shape: f32[32,4], index: 0, kind: input, shape index: {}]   ;;  %s581_s1 = inlined_call_operand.vmem [shape: f32[32,1], index: 1, kind: input, shape index: {}]   ;;  %s582_s2 = inlined_call_operand.vmem [shape: f32[2,4,256], index: 2, kind: input, shape index: {}]   ;;  %s583_s3 = inlined_call_operand.vmem [shape: f32[2,32,256], index: 3, kind: output, shape index: {}]  }
   0x1   :  { %s515_s14 = smov 0  }
   0x2 LB: > { %s25_s15 = sadd.s32 1, %s484_s13  ;;  %p418_p0 = scmp.ge.s32.totalorder %s488_s14, 1  ;;  %s488_s14 = sphi %s515_s14, %s13_s14   ;;  %s484_s13 = sphi %s513_s13, %s585_s13   ;;  %s480_s12 = sphi %s511_s12, %s584_s12  }
   0x3   : > { %p27_p1 = scmp.ge.s32.totalorder %s25_s15, 2  ;;  %p158_p2 = scmp.lt.s32.totalorder %s488_s14, 3 }
   0x5   : > { %s587_s15 = smov (%p27_p1, %s25_s15), 0  ;;  %p159_p3 = pnand %p418_p0, %p158_p2 }
   0x6   : > { %p191_p4 = scmp.lt.s32.totalorder (!%p159_p3), %s480_s12, 1 }
   0x7   : > { %162 = sbr.rel (%p159_p3) target bundleno = 170 (0xaa), region = 32 }
   0xc   : > { %v490_v0 = vmov 0   ;;  %v217_v1 = vld [vmem:[%s581_s1 + $0x10] sm:$0xff]  ;;  %s589_s12 = smov (!%p191_p4, %s480_s12), 1  ;;  %v215_v2 = vld [vmem:[%s581_s1] sm:$0xff]  ;;  %v218_v4 = vld [vmem:[%s581_s1 + $0x18] sm:$0xff]  ;;  %vm256_vm0 = vcmask 1043456  }
   0xd   : > { %465 = vset.pattern.permute.xlu1 %v490_v0  ;;  %464 = vset.pattern.permute.xlu0 %v490_v0  ;;  %s435_s20 = sshll.u32 %s589_s12, 3  ;;  %v216_v5 = vld [vmem:[%s581_s1 + $0x8] sm:$0xff]  ;;  %v210_v6 = vld [vmem:[%s580_s0] sm:$0xff]  ;;  %vm243_vm1 = vcmask 31744   ;;  %v212_v7 = vld [vmem:[%s580_s0 + $0x10] sm:$0xff]  ;;  %s436_s9 = sshll.u32 %s589_s12, 6 }
   0xe   : > { %231 = vperm.xlu1 %465, %v217_v1   ;;  %221 = vperm.xlu0 %464, %v215_v2   ;;  %s198_s23 = scalar_lea.vmem %s582_s2, %s435_s20  ;;  %v211_v10 = vld [vmem:[%s580_s0 + $0x8] sm:$0xff]  ;;  %v213_v11 = vld [vmem:[%s580_s0 + $0x18] sm:$0xff]  ;;  %s208_s16 = scalar_lea.vmem %s583_s3, %s436_s9 }
   0xf   : > { %v214_v3 = vld [vmem:[%s198_s23] sm:$0xff] }
  0x10   : > { %240 = vst [vmem:[#allocation1] ss:$2 sm:$0xff] %v214_v3 }
  0x16   : > { %236 = vperm.xlu1 %465, %v218_v4   ;;  %226 = vperm.xlu0 %464, %v216_v5  }
  0x17   : > { %v241_v8 = vld.sshfl [vmem:[#allocation1] sm:$0xff pattern:$0x75316420]  ;;  %v242_v9 = vld.sshfl [vmem:[#allocation1 + $0x8] sm:$0xff pattern:$0x75316420] }
  0x18   : > { %423 = vmatpush.msk.msra.mxu0 %vm256_vm0, %v241_v8  ;;  %437 = vmatpush.msk.msra.mxu2 %vm256_vm0, %v241_v8 }
  0x19   : > { %428 = vmatpush.msk.msra.mxu1 %vm256_vm0, %v242_v9  ;;  %438 = vmatpush.msk.msra.mxu3 %vm256_vm0, %v242_v9 }
  0x1a   : > { %424 = vmatmul.msk.f32.vlgmr.msra.gmra.mxu0 %vm243_vm1, %v210_v6  ;;  %426 = vmatmul.msk.f32.vlgmr.msra.gmra.mxu2 %vm243_vm1, %v212_v7 }
  0x1b   : > { %429 = vmatmul.msk.f32.vlgmr.msra.gmra.mxu1 %vm243_vm1, %v210_v6  ;;  %431 = vmatmul.msk.f32.vlgmr.msra.gmra.mxu3 %vm243_vm1, %v212_v7 }
  0x22   : > { %425 = vmatmul.msk.f32.gmra.mxu0 %vm243_vm1, %v211_v10  ;;  %427 = vmatmul.msk.f32.gmra.mxu2 %vm243_vm1, %v213_v11 }
  0x23   : > { %430 = vmatmul.msk.f32.gmra.mxu1 %vm243_vm1, %v211_v10  ;;  %432 = vmatmul.msk.f32.gmra.mxu3 %vm243_vm1, %v213_v11 }
  0x80   : > { %v222_v12 = vpop.permute.xlu0 %221  ;;  %v232_v17 = vpop.permute.xlu1 %231 }
  0x88   : > { %v227_v21 = vpop.permute.xlu0 %226  ;;  %v237_v27 = vpop.permute.xlu1 %236 }
  0x97   : > { %v278_v13 = vpop.f32.mrf.mxu0 }
  0x98   : > { %v279_v14 = vadd.f32 %v278_v13, %v222_v12  ;;  %v307_v15 = vpop.f32.mrf.mxu1 }
  0x99   : > { %v308_v16 = vadd.f32 %v307_v15, %v222_v12 }
  0x9a   : > { %319 = vst [vmem:[%s208_s16] sm:$0xff] %v279_v14 }
  0x9b   : > { %320 = vst [vmem:[%s208_s16 + $0x8] sm:$0xff] %v308_v16 }
  0x9d   : > { %v284_v18 = vpop.f32.mrf.mxu2 }
  0x9e   : > { %v285_v19 = vadd.f32 %v284_v18, %v232_v17  ;;  %v313_v20 = vpop.f32.mrf.mxu3 }
  0x9f   : > { %v314_v22 = vadd.f32 %v313_v20, %v232_v17  ;;  %v281_v23 = vpop.f32.mrf.mxu0 }
  0xa0   : > { %323 = vst [vmem:[%s208_s16 + $0x20] sm:$0xff] %v285_v19  ;;  %v282_v24 = vadd.f32 %v281_v23, %v227_v21  ;;  %v310_v25 = vpop.f32.mrf.mxu1 }
  0xa1   : > { %324 = vst [vmem:[%s208_s16 + $0x28] sm:$0xff] %v314_v22  ;;  %v311_v26 = vadd.f32 %v310_v25, %v227_v21 }
  0xa2   : > { %321 = vst [vmem:[%s208_s16 + $0x10] sm:$0xff] %v282_v24 }
  0xa3   : > { %322 = vst [vmem:[%s208_s16 + $0x18] sm:$0xff] %v311_v26 }
  0xa5   : > { %v287_v28 = vpop.f32.mrf.mxu2 }
  0xa6   : > { %v288_v29 = vadd.f32 %v287_v28, %v237_v27  ;;  %v316_v30 = vpop.f32.mrf.mxu3 }
  0xa7   : > { %v317_v31 = vadd.f32 %v316_v30, %v237_v27 }
  0xa8   : > { %325 = vst [vmem:[%s208_s16 + $0x30] sm:$0xff] %v288_v29 }
  0xa9   : > { %326 = vst [vmem:[%s208_s16 + $0x38] sm:$0xff] %v317_v31 }
  0xaa PF: > { %s13_s14 = sadd.s32 1, %s488_s14   ;;  %s584_s12 = smov %s484_s13 }
  0xab   : > { %p10_p5 = scmp.ge.s32.totalorder %s13_s14, 4   ;;  %s585_s13 = smov %s587_s15 }
  0xad   :  { %12 = sbr.rel (!%p10_p5) target bundleno = 2 (0x2), region = 62 }

</bundles_post_ra>
